<compile_context>
chip_gen: v7x
topology: tpu7x:2x2x1
jax: 0.10.0
libtpu: 0.0.40
codegen_flags: <defaults>
</compile_context>

<pallas_src>
import functools

import jax
import jax.numpy as jnp
from jax import lax
from jax.experimental import pallas as pl
from jax.experimental.pallas import tpu as pltpu


def _hd_kernel(x_ref, w_ref, b_ref, o_ref, *, H, W, KH, KW, pad):
    """Fused 3x3 conv + bias + ReLU + channel-concat for one batch block.

    x_ref : (Bt, Cin, H*W)         flattened NCHW input block
    w_ref : (Cout, KH*KW*Cin)      im2col-flattened weights (rows = (kh,kw,ci))
    b_ref : (Cout, 1)              bias
    o_ref : (Bt, Cin+Cout, H*W)    [x ; relu(conv(x)+b)] along channels
    """
    Bt, Cin, HW = x_ref.shape
    Cout = w_ref.shape[0]

    wmat = w_ref[...]            # tiny, stays VMEM-resident across the grid
    bvec = b_ref[...]            # (Cout, 1), broadcasts over lanes

    # Lane position -> image column index (used to mask W-direction wraps of
    # the flattened shifts).
    col = lax.broadcasted_iota(jnp.int32, (1, HW), 1) % W

    for bi in range(Bt):                       # static unroll over images
        x = x_ref[bi]                          # (Cin, HW)

        # Build the im2col patch matrix: row block (kh, kw) holds x shifted by
        # (kh-pad, kw-pad) with zero fill outside the image.
        taps = []
        for kh in range(KH):
            dh = kh - pad
            for kw in range(KW):
                dw = kw - pad
                off = dh * W + dw              # flattened shift
                if off > 0:
                    xs = jnp.concatenate(
                        [x[:, off:], jnp.zeros((Cin, off), x.dtype)], axis=1)
                elif off < 0:
                    xs = jnp.concatenate(
                        [jnp.zeros((Cin, -off), x.dtype), x[:, :HW + off]],
                        axis=1)
                else:
                    xs = x
                # Mask columns where the W-direction shift wrapped into the
                # neighbouring image row (H-direction overflow is already
                # handled by the zero fill at the ends of the flat array).
                if dw > 0:
                    xs = jnp.where(col < W - dw, xs, 0.0)
                elif dw < 0:
                    xs = jnp.where(col >= -dw, xs, 0.0)
                taps.append(xs)
        patches = jnp.concatenate(taps, axis=0)      # (KH*KW*Cin, HW)

        # Single MXU contraction over all taps and input channels.
        acc = lax.dot_general(
            wmat, patches,
            dimension_numbers=(((1,), (0,)), ((), ())),
            preferred_element_type=jnp.float32)       # (Cout, HW)
        y = jnp.maximum(acc + bvec, 0.0)

        # Fused channel concat: one dense (Cin+Cout, HW) store.
        o_ref[bi] = jnp.concatenate(
            [x.astype(o_ref.dtype), y.astype(o_ref.dtype)], axis=0)


def h_d_forward(x_nchw, weight_oihw, bias):
    """H_D.forward: concat([x, relu(conv2d(x) + b)], axis=1), NCHW in/out."""
    B, Cin, H, W = x_nchw.shape
    Cout, Cin_w, KH, KW = weight_oihw.shape
    assert Cin == Cin_w
    assert KH == KW and KH % 2 == 1, "odd square kernel assumed (pad = k >> 1)"
    pad = KH >> 1
    HW = H * W

    # Free reshapes only (merging trailing contiguous dims); no transposes,
    # no jnp.pad, no jnp.concatenate on the big tensors.
    x_flat = x_nchw.reshape(B, Cin, HW)
    # Weights -> (Cout, KH*KW*Cin) with rows ordered (kh, kw, ci) to match the
    # in-kernel patch construction.  Tiny one-off op.
    w2 = jnp.transpose(weight_oihw, (0, 2, 3, 1)).reshape(Cout, KH * KW * Cin)
    b2 = bias.reshape(Cout, 1)

    # Images per grid step: largest divisor of B whose input block stays under
    # ~2 MiB (amortizes per-step overhead, keeps double-buffered VMEM modest).
    per_img = Cin * HW * x_nchw.dtype.itemsize
    target = 2 * 1024 * 1024
    Bt = 1
    for d in range(1, B + 1):
        if B % d == 0 and d * per_img <= target:
            Bt = d
    grid = (B // Bt,)
    # TODO(synk): for very large H*W*Cin (v7x 64 MiB VMEM), add a spatial grid
    # axis with a 2-row halo instead of whole-image blocks.

    kernel = functools.partial(_hd_kernel, H=H, W=W, KH=KH, KW=KW, pad=pad)

    out_flat = pl.pallas_call(
        kernel,
        out_shape=jax.ShapeDtypeStruct((B, Cin + Cout, HW), x_nchw.dtype),
        grid_spec=pl.GridSpec(
            grid=grid,
            in_specs=[
                pl.BlockSpec((Bt, Cin, HW), lambda i: (i, 0, 0)),
                pl.BlockSpec((Cout, KH * KW * Cin), lambda i: (0, 0)),
                pl.BlockSpec((Cout, 1), lambda i: (0, 0)),
            ],
            out_specs=pl.BlockSpec((Bt, Cin + Cout, HW), lambda i: (i, 0, 0)),
        ),
        compiler_params=pltpu.CompilerParams(
            dimension_semantics=("parallel",)),
    )(x_flat, w2, b2)

    return out_flat.reshape(B, Cin + Cout, H, W)


def _reference(x_nchw, weight_oihw, bias):
    """Pure-JAX reference (lax conv) for correctness check."""
    y = lax.conv_general_dilated(
        x_nchw, weight_oihw, window_strides=(1, 1), padding="SAME",
        dimension_numbers=("NCHW", "OIHW", "NCHW"))
    y = jnp.maximum(y + bias[None, :, None, None], 0.0)
    return jnp.concatenate([x_nchw, y], axis=1)


if __name__ == "__main__":
    # Small shapes consistent with the module: B=2, Cin=4, H=W=16, growth=8.
    B, Cin, H, W = 2, 4, 16, 16
    growth_rate, ksize = 8, 3

    key = jax.random.PRNGKey(0)
    kx, kw, kb = jax.random.split(key, 3)

    x = jax.random.normal(kx, (B, Cin, H, W), dtype=jnp.float32)
    fan_in = Cin * ksize * ksize
    bound = 1.0 / (fan_in ** 0.5)
    weight = jax.random.uniform(kw, (growth_rate, Cin, ksize, ksize),
                                minval=-bound, maxval=bound,
                                dtype=jnp.float32)
    bias = jax.random.uniform(kb, (growth_rate,), minval=-bound,
                              maxval=bound, dtype=jnp.float32)

    out = jax.block_until_ready(h_d_forward(x, weight, bias))
    ref = jax.block_until_ready(_reference(x, weight, bias))

    assert out.shape == (B, Cin + growth_rate, H, W), out.shape
    assert jnp.allclose(out, ref, atol=1e-5, rtol=1e-5), (
        float(jnp.max(jnp.abs(out - ref))))
    print("KERNEL_OK")
</pallas_src>

<mosaic_0001>
module attributes {stable_mosaic.version = 11 : i64} {
  func.func @_hd_kernel(%arg0: i32, %arg1: memref<2x4x256xf32, #tpu.memory_space<vmem>>, %arg2: memref<8x36xf32, #tpu.memory_space<vmem>>, %arg3: memref<8x1xf32, #tpu.memory_space<vmem>>, %arg4: memref<2x12x256xf32, #tpu.memory_space<vmem>>) attributes {dimension_semantics = [#tpu.dimension_semantics<parallel>], iteration_bounds = array<i64: 1>, scalar_prefetch = 0 : i64, scratch_operands = 0 : i64, tpu.core_type = #tpu.core_type<tc>, window_params = [{transform_indices = @transform_0, window_bounds = array<i64: 2, 4, 256>}, {pipeline_mode = #tpu.pipeline_mode<synchronous>, transform_indices = @transform_1, window_bounds = array<i64: 8, 36>}, {pipeline_mode = #tpu.pipeline_mode<synchronous>, transform_indices = @transform_2, window_bounds = array<i64: 8, 1>}, {transform_indices = @transform_3, window_bounds = array<i64: 2, 12, 256>}]} {
    %c0 = arith.constant 0 : index
    %c0_0 = arith.constant 0 : index
    %0 = vector.load %arg2[%c0, %c0_0] : memref<8x36xf32, #tpu.memory_space<vmem>>, vector<8x36xf32>
    %c0_1 = arith.constant 0 : index
    %c0_2 = arith.constant 0 : index
    %1 = vector.load %arg3[%c0_1, %c0_2] : memref<8x1xf32, #tpu.memory_space<vmem>>, vector<8x1xf32>
    %2 = tpu.iota {dimensions = array<i32: 1>} : vector<1x256xi32>
    %c16_i32 = arith.constant 16 : i32
    %c0_i32 = arith.constant 0 : i32
    %3 = arith.cmpi eq, %c16_i32, %c0_i32 : i32
    %c1_i32 = arith.constant 1 : i32
    %4 = arith.select %3, %c1_i32, %c16_i32 : i32
    %5 = vector.broadcast %4 : i32 to vector<1x256xi32>
    %6 = arith.remsi %2, %5 : vector<1x256xi32>
    %c0_i32_3 = arith.constant 0 : i32
    %7 = vector.broadcast %c0_i32_3 : i32 to vector<1x256xi32>
    %8 = arith.cmpi ne, %6, %7 : vector<1x256xi32>
    %c0_i32_4 = arith.constant 0 : i32
    %9 = vector.broadcast %c0_i32_4 : i32 to vector<1x256xi32>
    %10 = arith.cmpi slt, %6, %9 : vector<1x256xi32>
    %c0_i32_5 = arith.constant 0 : i32
    %11 = arith.cmpi slt, %4, %c0_i32_5 : i32
    %12 = vector.broadcast %11 : i1 to vector<1x256xi1>
    %13 = vector.broadcast %12 : vector<1x256xi1> to vector<1x256xi1>
    %14 = arith.xori %10, %13 : vector<1x256xi1>
    %15 = arith.andi %14, %8 : vector<1x256xi1>
    %16 = vector.broadcast %4 : i32 to vector<1x256xi32>
    %17 = arith.addi %6, %16 : vector<1x256xi32>
    %18 = arith.select %15, %17, %6 : vector<1x256xi1>, vector<1x256xi32>
    %c0_6 = arith.constant 0 : index
    %c0_7 = arith.constant 0 : index
    %c0_8 = arith.constant 0 : index
    %19 = vector.load %arg1[%c0_6, %c0_7, %c0_8] : memref<2x4x256xf32, #tpu.memory_space<vmem>>, vector<1x4x256xf32>
    %20 = vector.shape_cast %19 : vector<1x4x256xf32> to vector<4x256xf32>
    %cst = arith.constant 0.000000e+00 : f32
    %21 = vector.broadcast %cst : f32 to vector<4x17xf32>
    %22 = vector.extract_strided_slice %20 {offsets = [0, 0], sizes = [4, 239], strides = [1, 1]} : vector<4x256xf32> to vector<4x239xf32>
    %23 = tpu.concatenate %21, %22 in 1 : vector<4x17xf32>, vector<4x239xf32> -> vector<4x256xf32>
    %c1_i32_9 = arith.constant 1 : i32
    %24 = vector.broadcast %c1_i32_9 : i32 to vector<1x256xi32>
    %25 = arith.cmpi sge, %18, %24 : vector<1x256xi32>
    %cst_10 = arith.constant 0.000000e+00 : f32
    %26 = vector.shape_cast %25 : vector<1x256xi1> to vector<1x256xi1>
    %27 = vector.broadcast %26 : vector<1x256xi1> to vector<4x256xi1>
    %28 = vector.broadcast %cst_10 : f32 to vector<4x256xf32>
    %29 = arith.select %27, %23, %28 : vector<4x256xi1>, vector<4x256xf32>
    %cst_11 = arith.constant 0.000000e+00 : f32
    %30 = vector.broadcast %cst_11 : f32 to vector<4x16xf32>
    %31 = vector.extract_strided_slice %20 {offsets = [0, 0], sizes = [4, 240], strides = [1, 1]} : vector<4x256xf32> to vector<4x240xf32>
    %32 = tpu.concatenate %30, %31 in 1 : vector<4x16xf32>, vector<4x240xf32> -> vector<4x256xf32>
    %cst_12 = arith.constant 0.000000e+00 : f32
    %33 = vector.broadcast %cst_12 : f32 to vector<4x15xf32>
    %34 = vector.extract_strided_slice %20 {offsets = [0, 0], sizes = [4, 241], strides = [1, 1]} : vector<4x256xf32> to vector<4x241xf32>
    %35 = tpu.concatenate %33, %34 in 1 : vector<4x15xf32>, vector<4x241xf32> -> vector<4x256xf32>
    %c15_i32 = arith.constant 15 : i32
    %36 = vector.broadcast %c15_i32 : i32 to vector<1x256xi32>
    %37 = arith.cmpi slt, %18, %36 : vector<1x256xi32>
    %cst_13 = arith.constant 0.000000e+00 : f32
    %38 = vector.shape_cast %37 : vector<1x256xi1> to vector<1x256xi1>
    %39 = vector.broadcast %38 : vector<1x256xi1> to vector<4x256xi1>
    %40 = vector.broadcast %cst_13 : f32 to vector<4x256xf32>
    %41 = arith.select %39, %35, %40 : vector<4x256xi1>, vector<4x256xf32>
    %cst_14 = arith.constant 0.000000e+00 : f32
    %42 = vector.broadcast %cst_14 : f32 to vector<4x1xf32>
    %43 = vector.extract_strided_slice %20 {offsets = [0, 0], sizes = [4, 255], strides = [1, 1]} : vector<4x256xf32> to vector<4x255xf32>
    %44 = tpu.concatenate %42, %43 in 1 : vector<4x1xf32>, vector<4x255xf32> -> vector<4x256xf32>
    %c1_i32_15 = arith.constant 1 : i32
    %45 = vector.broadcast %c1_i32_15 : i32 to vector<1x256xi32>
    %46 = arith.cmpi sge, %18, %45 : vector<1x256xi32>
    %cst_16 = arith.constant 0.000000e+00 : f32
    %47 = vector.shape_cast %46 : vector<1x256xi1> to vector<1x256xi1>
    %48 = vector.broadcast %47 : vector<1x256xi1> to vector<4x256xi1>
    %49 = vector.broadcast %cst_16 : f32 to vector<4x256xf32>
    %50 = arith.select %48, %44, %49 : vector<4x256xi1>, vector<4x256xf32>
    %51 = vector.extract_strided_slice %20 {offsets = [0, 1], sizes = [4, 255], strides = [1, 1]} : vector<4x256xf32> to vector<4x255xf32>
    %cst_17 = arith.constant 0.000000e+00 : f32
    %52 = vector.broadcast %cst_17 : f32 to vector<4x1xf32>
    %53 = tpu.concatenate %51, %52 in 1 : vector<4x255xf32>, vector<4x1xf32> -> vector<4x256xf32>
    %c15_i32_18 = arith.constant 15 : i32
    %54 = vector.broadcast %c15_i32_18 : i32 to vector<1x256xi32>
    %55 = arith.cmpi slt, %18, %54 : vector<1x256xi32>
    %cst_19 = arith.constant 0.000000e+00 : f32
    %56 = vector.shape_cast %55 : vector<1x256xi1> to vector<1x256xi1>
    %57 = vector.broadcast %56 : vector<1x256xi1> to vector<4x256xi1>
    %58 = vector.broadcast %cst_19 : f32 to vector<4x256xf32>
    %59 = arith.select %57, %53, %58 : vector<4x256xi1>, vector<4x256xf32>
    %60 = vector.extract_strided_slice %20 {offsets = [0, 15], sizes = [4, 241], strides = [1, 1]} : vector<4x256xf32> to vector<4x241xf32>
    %cst_20 = arith.constant 0.000000e+00 : f32
    %61 = vector.broadcast %cst_20 : f32 to vector<4x15xf32>
    %62 = tpu.concatenate %60, %61 in 1 : vector<4x241xf32>, vector<4x15xf32> -> vector<4x256xf32>
    %c1_i32_21 = arith.constant 1 : i32
    %63 = vector.broadcast %c1_i32_21 : i32 to vector<1x256xi32>
    %64 = arith.cmpi sge, %18, %63 : vector<1x256xi32>
    %cst_22 = arith.constant 0.000000e+00 : f32
    %65 = vector.shape_cast %64 : vector<1x256xi1> to vector<1x256xi1>
    %66 = vector.broadcast %65 : vector<1x256xi1> to vector<4x256xi1>
    %67 = vector.broadcast %cst_22 : f32 to vector<4x256xf32>
    %68 = arith.select %66, %62, %67 : vector<4x256xi1>, vector<4x256xf32>
    %69 = vector.extract_strided_slice %20 {offsets = [0, 16], sizes = [4, 240], strides = [1, 1]} : vector<4x256xf32> to vector<4x240xf32>
    %cst_23 = arith.constant 0.000000e+00 : f32
    %70 = vector.broadcast %cst_23 : f32 to vector<4x16xf32>
    %71 = tpu.concatenate %69, %70 in 1 : vector<4x240xf32>, vector<4x16xf32> -> vector<4x256xf32>
    %72 = vector.extract_strided_slice %20 {offsets = [0, 17], sizes = [4, 239], strides = [1, 1]} : vector<4x256xf32> to vector<4x239xf32>
    %cst_24 = arith.constant 0.000000e+00 : f32
    %73 = vector.broadcast %cst_24 : f32 to vector<4x17xf32>
    %74 = tpu.concatenate %72, %73 in 1 : vector<4x239xf32>, vector<4x17xf32> -> vector<4x256xf32>
    %c15_i32_25 = arith.constant 15 : i32
    %75 = vector.broadcast %c15_i32_25 : i32 to vector<1x256xi32>
    %76 = arith.cmpi slt, %18, %75 : vector<1x256xi32>
    %cst_26 = arith.constant 0.000000e+00 : f32
    %77 = vector.shape_cast %76 : vector<1x256xi1> to vector<1x256xi1>
    %78 = vector.broadcast %77 : vector<1x256xi1> to vector<4x256xi1>
    %79 = vector.broadcast %cst_26 : f32 to vector<4x256xf32>
    %80 = arith.select %78, %74, %79 : vector<4x256xi1>, vector<4x256xf32>
    %81 = tpu.concatenate %29, %32, %41, %50, %20, %59, %68, %71, %80 in 0 : vector<4x256xf32>, vector<4x256xf32>, vector<4x256xf32>, vector<4x256xf32>, vector<4x256xf32>, vector<4x256xf32>, vector<4x256xf32>, vector<4x256xf32>, vector<4x256xf32> -> vector<36x256xf32>
    %cst_27 = arith.constant dense<0.000000e+00> : vector<8x256xf32>
    %82 = tpu.matmul %0, %81, %cst_27 {dimension_numbers = #tpu.dot_dimension_numbers<[1], [0], [0], [1], [0, 0, 1, 1], [], []>} : vector<8x36xf32>, vector<36x256xf32>, vector<8x256xf32> -> vector<8x256xf32>
    %83 = vector.broadcast %1 : vector<8x1xf32> to vector<8x256xf32>
    %84 = arith.addf %82, %83 : vector<8x256xf32>
    %cst_28 = arith.constant 0.000000e+00 : f32
    %85 = vector.broadcast %cst_28 : f32 to vector<8x256xf32>
    %86 = arith.maximumf %84, %85 : vector<8x256xf32>
    %87 = tpu.concatenate %20, %86 in 0 : vector<4x256xf32>, vector<8x256xf32> -> vector<12x256xf32>
    %c0_29 = arith.constant 0 : index
    %c0_30 = arith.constant 0 : index
    %c0_31 = arith.constant 0 : index
    %88 = vector.load %arg4[%c0_29, %c0_30, %c0_31] : memref<2x12x256xf32, #tpu.memory_space<vmem>>, vector<1x12x256xf32>
    %89 = vector.shape_cast %88 : vector<1x12x256xf32> to vector<12x256xf32>
    %90 = vector.shape_cast %87 : vector<12x256xf32> to vector<1x12x256xf32>
    tpu.vector_store %arg4[%c0_29, %c0_30, %c0_31], %90 {strides = array<i32>} : memref<2x12x256xf32, #tpu.memory_space<vmem>>, vector<1x12x256xf32>,
    %c1 = arith.constant 1 : index
    %c0_32 = arith.constant 0 : index
    %c0_33 = arith.constant 0 : index
    %91 = vector.load %arg1[%c1, %c0_32, %c0_33] : memref<2x4x256xf32, #tpu.memory_space<vmem>>, vector<1x4x256xf32>
    %92 = vector.shape_cast %91 : vector<1x4x256xf32> to vector<4x256xf32>
    %cst_34 = arith.constant 0.000000e+00 : f32
    %93 = vector.broadcast %cst_34 : f32 to vector<4x17xf32>
    %94 = vector.extract_strided_slice %92 {offsets = [0, 0], sizes = [4, 239], strides = [1, 1]} : vector<4x256xf32> to vector<4x239xf32>
    %95 = tpu.concatenate %93, %94 in 1 : vector<4x17xf32>, vector<4x239xf32> -> vector<4x256xf32>
    %c1_i32_35 = arith.constant 1 : i32
    %96 = vector.broadcast %c1_i32_35 : i32 to vector<1x256xi32>
    %97 = arith.cmpi sge, %18, %96 : vector<1x256xi32>
    %cst_36 = arith.constant 0.000000e+00 : f32
    %98 = vector.shape_cast %97 : vector<1x256xi1> to vector<1x256xi1>
    %99 = vector.broadcast %98 : vector<1x256xi1> to vector<4x256xi1>
    %100 = vector.broadcast %cst_36 : f32 to vector<4x256xf32>
    %101 = arith.select %99, %95, %100 : vector<4x256xi1>, vector<4x256xf32>
    %cst_37 = arith.constant 0.000000e+00 : f32
    %102 = vector.broadcast %cst_37 : f32 to vector<4x16xf32>
    %103 = vector.extract_strided_slice %92 {offsets = [0, 0], sizes = [4, 240], strides = [1, 1]} : vector<4x256xf32> to vector<4x240xf32>
    %104 = tpu.concatenate %102, %103 in 1 : vector<4x16xf32>, vector<4x240xf32> -> vector<4x256xf32>
    %cst_38 = arith.constant 0.000000e+00 : f32
    %105 = vector.broadcast %cst_38 : f32 to vector<4x15xf32>
    %106 = vector.extract_strided_slice %92 {offsets = [0, 0], sizes = [4, 241], strides = [1, 1]} : vector<4x256xf32> to vector<4x241xf32>
    %107 = tpu.concatenate %105, %106 in 1 : vector<4x15xf32>, vector<4x241xf32> -> vector<4x256xf32>
    %c15_i32_39 = arith.constant 15 : i32
    %108 = vector.broadcast %c15_i32_39 : i32 to vector<1x256xi32>
    %109 = arith.cmpi slt, %18, %108 : vector<1x256xi32>
    %cst_40 = arith.constant 0.000000e+00 : f32
    %110 = vector.shape_cast %109 : vector<1x256xi1> to vector<1x256xi1>
    %111 = vector.broadcast %110 : vector<1x256xi1> to vector<4x256xi1>
    %112 = vector.broadcast %cst_40 : f32 to vector<4x256xf32>
    %113 = arith.select %111, %107, %112 : vector<4x256xi1>, vector<4x256xf32>
    %cst_41 = arith.constant 0.000000e+00 : f32
    %114 = vector.broadcast %cst_41 : f32 to vector<4x1xf32>
    %115 = vector.extract_strided_slice %92 {offsets = [0, 0], sizes = [4, 255], strides = [1, 1]} : vector<4x256xf32> to vector<4x255xf32>
    %116 = tpu.concatenate %114, %115 in 1 : vector<4x1xf32>, vector<4x255xf32> -> vector<4x256xf32>
    %c1_i32_42 = arith.constant 1 : i32
    %117 = vector.broadcast %c1_i32_42 : i32 to vector<1x256xi32>
    %118 = arith.cmpi sge, %18, %117 : vector<1x256xi32>
    %cst_43 = arith.constant 0.000000e+00 : f32
    %119 = vector.shape_cast %118 : vector<1x256xi1> to vector<1x256xi1>
    %120 = vector.broadcast %119 : vector<1x256xi1> to vector<4x256xi1>
    %121 = vector.broadcast %cst_43 : f32 to vector<4x256xf32>
    %122 = arith.select %120, %116, %121 : vector<4x256xi1>, vector<4x256xf32>
    %123 = vector.extract_strided_slice %92 {offsets = [0, 1], sizes = [4, 255], strides = [1, 1]} : vector<4x256xf32> to vector<4x255xf32>
    %cst_44 = arith.constant 0.000000e+00 : f32
    %124 = vector.broadcast %cst_44 : f32 to vector<4x1xf32>
    %125 = tpu.concatenate %123, %124 in 1 : vector<4x255xf32>, vector<4x1xf32> -> vector<4x256xf32>
    %c15_i32_45 = arith.constant 15 : i32
    %126 = vector.broadcast %c15_i32_45 : i32 to vector<1x256xi32>
    %127 = arith.cmpi slt, %18, %126 : vector<1x256xi32>
    %cst_46 = arith.constant 0.000000e+00 : f32
    %128 = vector.shape_cast %127 : vector<1x256xi1> to vector<1x256xi1>
    %129 = vector.broadcast %128 : vector<1x256xi1> to vector<4x256xi1>
    %130 = vector.broadcast %cst_46 : f32 to vector<4x256xf32>
    %131 = arith.select %129, %125, %130 : vector<4x256xi1>, vector<4x256xf32>
    %132 = vector.extract_strided_slice %92 {offsets = [0, 15], sizes = [4, 241], strides = [1, 1]} : vector<4x256xf32> to vector<4x241xf32>
    %cst_47 = arith.constant 0.000000e+00 : f32
    %133 = vector.broadcast %cst_47 : f32 to vector<4x15xf32>
    %134 = tpu.concatenate %132, %133 in 1 : vector<4x241xf32>, vector<4x15xf32> -> vector<4x256xf32>
    %c1_i32_48 = arith.constant 1 : i32
    %135 = vector.broadcast %c1_i32_48 : i32 to vector<1x256xi32>
    %136 = arith.cmpi sge, %18, %135 : vector<1x256xi32>
    %cst_49 = arith.constant 0.000000e+00 : f32
    %137 = vector.shape_cast %136 : vector<1x256xi1> to vector<1x256xi1>
    %138 = vector.broadcast %137 : vector<1x256xi1> to vector<4x256xi1>
    %139 = vector.broadcast %cst_49 : f32 to vector<4x256xf32>
    %140 = arith.select %138, %134, %139 : vector<4x256xi1>, vector<4x256xf32>
    %141 = vector.extract_strided_slice %92 {offsets = [0, 16], sizes = [4, 240], strides = [1, 1]} : vector<4x256xf32> to vector<4x240xf32>
    %cst_50 = arith.constant 0.000000e+00 : f32
    %142 = vector.broadcast %cst_50 : f32 to vector<4x16xf32>
    %143 = tpu.concatenate %141, %142 in 1 : vector<4x240xf32>, vector<4x16xf32> -> vector<4x256xf32>
    %144 = vector.extract_strided_slice %92 {offsets = [0, 17], sizes = [4, 239], strides = [1, 1]} : vector<4x256xf32> to vector<4x239xf32>
    %cst_51 = arith.constant 0.000000e+00 : f32
    %145 = vector.broadcast %cst_51 : f32 to vector<4x17xf32>
    %146 = tpu.concatenate %144, %145 in 1 : vector<4x239xf32>, vector<4x17xf32> -> vector<4x256xf32>
    %c15_i32_52 = arith.constant 15 : i32
    %147 = vector.broadcast %c15_i32_52 : i32 to vector<1x256xi32>
    %148 = arith.cmpi slt, %18, %147 : vector<1x256xi32>
    %cst_53 = arith.constant 0.000000e+00 : f32
    %149 = vector.shape_cast %148 : vector<1x256xi1> to vector<1x256xi1>
    %150 = vector.broadcast %149 : vector<1x256xi1> to vector<4x256xi1>
    %151 = vector.broadcast %cst_53 : f32 to vector<4x256xf32>
    %152 = arith.select %150, %146, %151 : vector<4x256xi1>, vector<4x256xf32>
    %153 = tpu.concatenate %101, %104, %113, %122, %92, %131, %140, %143, %152 in 0 : vector<4x256xf32>, vector<4x256xf32>, vector<4x256xf32>, vector<4x256xf32>, vector<4x256xf32>, vector<4x256xf32>, vector<4x256xf32>, vector<4x256xf32>, vector<4x256xf32> -> vector<36x256xf32>
    %cst_54 = arith.constant dense<0.000000e+00> : vector<8x256xf32>
    %154 = tpu.matmul %0, %153, %cst_54 {dimension_numbers = #tpu.dot_dimension_numbers<[1], [0], [0], [1], [0, 0, 1, 1], [], []>} : vector<8x36xf32>, vector<36x256xf32>, vector<8x256xf32> -> vector<8x256xf32>
    %155 = vector.broadcast %1 : vector<8x1xf32> to vector<8x256xf32>
    %156 = arith.addf %154, %155 : vector<8x256xf32>
    %cst_55 = arith.constant 0.000000e+00 : f32
    %157 = vector.broadcast %cst_55 : f32 to vector<8x256xf32>
    %158 = arith.maximumf %156, %157 : vector<8x256xf32>
    %159 = tpu.concatenate %92, %158 in 0 : vector<4x256xf32>, vector<8x256xf32> -> vector<12x256xf32>
    %c1_56 = arith.constant 1 : index
    %c0_57 = arith.constant 0 : index
    %c0_58 = arith.constant 0 : index
    %160 = vector.load %arg4[%c1_56, %c0_57, %c0_58] : memref<2x12x256xf32, #tpu.memory_space<vmem>>, vector<1x12x256xf32>
    %161 = vector.shape_cast %160 : vector<1x12x256xf32> to vector<12x256xf32>
    %162 = vector.shape_cast %159 : vector<12x256xf32> to vector<1x12x256xf32>
    tpu.vector_store %arg4[%c1_56, %c0_57, %c0_58], %162 {strides = array<i32>} : memref<2x12x256xf32, #tpu.memory_space<vmem>>, vector<1x12x256xf32>,
    return
  }
  func.func @transform_0(%arg0: i32) -> (i32, i32, i32) {
    %c0_i32 = arith.constant 0 : i32
    %c0_i32_0 = arith.constant 0 : i32
    %c0_i32_1 = arith.constant 0 : i32
    return %arg0, %c0_i32, %c0_i32_0 : i32, i32, i32
  }
  func.func @transform_1(%arg0: i32) -> (i32, i32) {
    %c0_i32 = arith.constant 0 : i32
    %c0_i32_0 = arith.constant 0 : i32
    %c0_i32_1 = arith.constant 0 : i32
    return %c0_i32, %c0_i32_0 : i32, i32
  }
  func.func @transform_2(%arg0: i32) -> (i32, i32) {
    %c0_i32 = arith.constant 0 : i32
    %c0_i32_0 = arith.constant 0 : i32
    %c0_i32_1 = arith.constant 0 : i32
    return %c0_i32, %c0_i32_0 : i32, i32
  }
  func.func @transform_3(%arg0: i32) -> (i32, i32, i32) {
    %c0_i32 = arith.constant 0 : i32
    %c0_i32_0 = arith.constant 0 : i32
    %c0_i32_1 = arith.constant 0 : i32
    return %arg0, %c0_i32, %c0_i32_0 : i32, i32, i32
  }
}

</mosaic_0001>

<bundles_post_ra>
// kernel: tpu_custom_call.1
= control target key start
LH: loop header
LB: loop body
LE: loop exit
PB: predicated region body
PF: predicated region fallthrough
CT: control target
= control target key end

     0   :  { %8 = vsyncpa [#allocation3], 0  ;;  %s628_s12 = smov [#allocation2]   ;;  %s866_s0 = inlined_call_operand.hbm [shape: f32[2,4,256], index: 0, kind: input, shape index: {}]   ;;  %s867_s1 = inlined_call_operand.vmem [shape: f32[8,36], index: 1, kind: input, shape index: {}]   ;;  %s868_s2 = inlined_call_operand.vmem [shape: f32[8,1], index: 2, kind: input, shape index: {}]   ;;  %s869_s3 = inlined_call_operand.vmem [shape: f32[2,12,256], index: 3, kind: output, shape index: {}]  }
   0x1   :  { %s14_s13 = sshll.u32 %s628_s12, 4  ;;  %s604_s16 = scalar_lea.hbm %s866_s0, 256  ;;  %s15_s13 = int_to_ptr.vmem [resolvable:$true] %s14_s13 }
   0x2   :  { %p605_p0 = scmp.ne.s32.totalorder %s866_s0, %s604_s16  ;;  %p608_p1 = scmp.lt.u32.totalorder %s604_s16, %s866_s0 }
   0x4   :  { %p610_p2 = pnand %p608_p1, %p605_p0 }
   0x6   :  { %613 = shalt.err (!%p610_p2)
}
   0x7   :  { %s614_s21 = scalar_lea.vmem %s15_s13, 256  ;;  %p619_p4 = scmp.lt.s32.totalorder %s15_s13, %s15_s13 }
   0x8   :  { %p615_p3 = scmp.ne.s32.totalorder %s15_s13, %s614_s21  ;;  %p620_p5 = scmp.lt.s32.totalorder %s614_s21, %s614_s21 }
   0xa   :  { %p621_p6 = por %p620_p5, %p619_p4 }
   0xc   :  { %p622_p7 = pnand %p621_p6, %p615_p3 }
   0xe   :  { %625 = shalt.err (!%p622_p7)
}
   0xf   :  { %s629_s22 = smov 128   ;;  %s630_s23 = smov 8  }
  0x10   :  { %20 = dma.hbm_to_vmem [thread:$0]  %s866_s0, 256, %s15_s13, [#allocation3], %s629_s22, %s629_s22, %s630_s23  }
  0x11   :  { %626 = dma.done.wait [#allocation3], 256  }
  0x12   :  { %627 = vsyncadd [#allocation3], 4294967040  ;;  %v673_v0 = vld [vmem:[#allocation2] sm:$0xff]  ;;  %v675_v1 = vld [vmem:[#allocation2 + $0x8] sm:$0xff]  ;;  %s631_s26 = smov 16   ;;  %s632_s0 = smov 1   ;;  %v30_v11 = vlaneseq }
  0x13   :  { %v679_v2 = vcombine.high %v673_v0, %v673_v0  ;;  %v683_v3 = vcombine.high %v675_v1, %v675_v1  ;;  %s633_s27 = smov 15   ;;  %s634_s28 = smov 17   ;;  %v576_v6 = vpack.i.bf16 %v675_v1, %v673_v0  ;;  %v638_v8 = vmov 0.0   ;;  %v29_v10 = vld [vmem:[%s868_s2] sm:$0xff] }
  0x14   :  { %s635_s29 = smov 127   ;;  %s636_s30 = smov 113   ;;  %265 = vmatprep.mubr.f32.mxu0 %v638_v8  ;;  %465 = vmatprep.mubr.f32.mxu1 %v638_v8  ;;  %v639_v9 = vmov 0   ;;  %v31_v12 = vand.u32 127, %v30_v11  ;;  %vm81_vm0 = vcmask 130048   ;;  %vm106_vm1 = vcmask 7168  }
  0x15   :  { %v541_v4 = vpack.i.bf16 %v679_v2, %v673_v0  ;;  %v546_v5 = vpack.i.bf16 %v683_v3, %v675_v1  ;;  %v571_v7 = vpack.i.bf16 %v683_v3, %v679_v2  ;;  %s637_s4 = smov 112   ;;  %601 = vset.pattern.permute.xlu0 %v639_v9  ;;  %s640_s5 = smov 111   ;;  %vm89_vm3 = vcmask 121856  }
  0x16   :  { %v32_v13 = vadd.s32 128, %v31_v12  ;;  %v37_v14 = vand.u32 15, %v31_v12  ;;  %vm64_vm4 = vcmask 138240   ;;  %vm177_vm8 = vcmask 1043456  }
  0x17   :  { %542 = vrot.lane.b32.xlu1 %v541_v4, %s631_s26  ;;  %532 = vrot.lane.b32.xlu0 %v541_v4, %s632_s0  ;;  %vm117_vm9 = vcmask 1039360   ;;  %vm128_vm10 = vcmask 924672   ;;  %vm139_vm11 = vcmask 916480   ;;  %vm147_vm12 = vcmask 908288  }
  0x18   :  { %v44_v17 = vand.u32 15, %v32_v13  ;;  %vm700_vm2 = vcmp.ge.s32.totalorder %v37_v14, 1  ;;  %vm714_vm6 = vcmp.lt.s32.totalorder %v37_v14, 15  ;;  %vm191_vm13 = vcmask 293888  }
  0x1a   :  { %vm707_vm5 = vcmp.ge.s32.totalorder %v44_v17, 1  ;;  %vm718_vm7 = vcmp.lt.s32.totalorder %v44_v17, 15 }
  0x1b   :  { %547 = vrot.lane.b32.xlu1 %v546_v5, %s631_s26  ;;  %537 = vrot.lane.b32.xlu0 %v546_v5, %s632_s0 }
  0x1f   :  { %557 = vrot.lane.b32.xlu1 %v541_v4, %s633_s27  ;;  %552 = vrot.lane.b32.xlu0 %v541_v4, %s634_s28 }
  0x23   :  { %567 = vrot.lane.b32.xlu1 %v546_v5, %s633_s27  ;;  %562 = vrot.lane.b32.xlu0 %v546_v5, %s634_s28 }
  0x27   :  { %577 = vrot.lane.b32.xlu1 %v576_v6, %s635_s29  ;;  %572 = vrot.lane.b32.xlu0 %v571_v7, %s635_s29 }
  0x2b   :  { %587 = vrot.lane.b32.xlu1 %v571_v7, %s636_s30  ;;  %582 = vrot.lane.b32.xlu0 %v571_v7, %s637_s4 }
  0x2f   :  { %597 = vrot.lane.b32.xlu1 %v576_v6, %s636_s30  ;;  %592 = vrot.lane.b32.xlu0 %v576_v6, %s637_s4 }
  0x33   :  { %356 = vrot.lane.b32.xlu1 %v683_v3, %s640_s5  ;;  %145 = vrot.lane.b32.xlu0 %v679_v2, %s640_s5 }
  0x37   :  { %354 = vrot.lane.b32.xlu1 %v675_v1, %s640_s5  ;;  %143 = vrot.lane.b32.xlu0 %v673_v0, %s640_s5 }
  0x3b   :  { %188 = vperm.xlu0 %601, %v29_v10  }
  0x89   :  { %v543_v15 = vpop.permute.xlu1 %542  ;;  %v533_v16 = vpop.permute.xlu0 %532 }
  0x8a   :  { %v545_v18 = vunpack.i.h.bf16 %v543_v15  ;;  %v544_v19 = vunpack.i.l.bf16 %v543_v15  ;;  %v535_v20 = vunpack.i.h.bf16 %v533_v16  ;;  %v534_v21 = vunpack.i.l.bf16 %v533_v16 }
  0x8c   :  { %v110_v23 = vsel %vm106_vm1, 0.0, %v534_v21  ;;  %v84_v24 = vsel %vm81_vm0, 0.0, %v544_v19  ;;  %v107_v25 = vsel %vm106_vm1, %v534_v21, %v535_v20  ;;  %v82_v29 = vsel %vm81_vm0, %v544_v19, %v545_v18 }
  0x8d   :  { %v548_v26 = vpop.permute.xlu1 %547  ;;  %v538_v27 = vpop.permute.xlu0 %537  ;;  %v111_v30 = vsel %vm700_vm2, %v110_v23, 0.0  ;;  %v155_v37 = vrot.slane %v84_v24, 4  ;;  %v112_v39 = vsel %vm707_vm5, %v107_v25, 0.0  ;;  %v156_v46 = vrot.slane %v82_v29, 4 }
  0x8e   :  { %v550_v31 = vunpack.i.h.bf16 %v548_v26  ;;  %v549_v32 = vunpack.i.l.bf16 %v548_v26  ;;  %v540_v33 = vunpack.i.h.bf16 %v538_v27  ;;  %v539_v34 = vunpack.i.l.bf16 %v538_v27 }
  0x8f   :  { %v161_v41 = vrot.slane %v111_v30, 4  ;;  %v162_v53 = vrot.slane %v112_v39, 4 }
  0x90   :  { %v723_v38 = vsel %vm81_vm0, 0.0, %v549_v32  ;;  %v728_v40 = vsel %vm81_vm0, %v549_v32, %v550_v31  ;;  %v321_v42 = vsel %vm106_vm1, %v539_v34, %v540_v33  ;;  %v324_v43 = vsel %vm106_vm1, 0.0, %v539_v34 }
  0x91   :  { %v558_v44 = vpop.permute.xlu1 %557  ;;  %v553_v45 = vpop.permute.xlu0 %552  ;;  %v325_v47 = vsel %vm700_vm2, %v324_v43, 0.0  ;;  %v365_v51 = vrot.slane %v723_v38, 4  ;;  %v366_v54 = vrot.slane %v728_v40, 4  ;;  %v326_v58 = vsel %vm707_vm5, %v321_v42, 0.0 }
  0x92   :  { %v560_v48 = vunpack.i.h.bf16 %v558_v44  ;;  %v559_v49 = vunpack.i.l.bf16 %v558_v44  ;;  %v555_v50 = vunpack.i.h.bf16 %v553_v45  ;;  %v554_v52 = vunpack.i.l.bf16 %v553_v45 }
  0x93   :  { %v736_v55 = vrot.slane %v325_v47, 4  ;;  %v372_v31 = vrot.slane %v326_v58, 4 }
  0x94   :  { %v93_v56 = vsel %vm89_vm3, 0.0, %v559_v49  ;;  %v90_v57 = vsel %vm89_vm3, %v559_v49, %v560_v48  ;;  %v68_v59 = vsel %vm64_vm4, 0.0, %v554_v52  ;;  %v65_v62 = vsel %vm64_vm4, %v554_v52, %v555_v50 }
  0x95   :  { %v568_v60 = vpop.permute.xlu1 %567  ;;  %v563_v61 = vpop.permute.xlu0 %562  ;;  %v101_v63 = vsel %vm718_vm7, %v90_v57, 0.0  ;;  %v100_v4 = vsel %vm714_vm6, %v93_v56, 0.0  ;;  %v76_v9 = vsel %vm707_vm5, %v65_v62, 0.0  ;;  %v75_v11 = vsel %vm700_vm2, %v68_v59, 0.0 }
  0x96   :  { %v570_v5 = vunpack.i.h.bf16 %v568_v60  ;;  %v569_v6 = vunpack.i.l.bf16 %v568_v60  ;;  %v565_v7 = vunpack.i.h.bf16 %v563_v61  ;;  %v564_v8 = vunpack.i.l.bf16 %v563_v61 }
  0x97   :  { %v181_v10 = vsel %vm177_vm8, %v101_v63, %v162_v53  ;;  %v180_v12 = vsel %vm177_vm8, %v100_v4, %v161_v41  ;;  %v179_v15 = vsel %vm177_vm8, %v76_v9, %v156_v46  ;;  %v178_v16 = vsel %vm177_vm8, %v75_v11, %v155_v37 }
  0x98   :  { %v314_v13 = vsel %vm89_vm3, 0.0, %v569_v6  ;;  %v297_v14 = vsel %vm64_vm4, 0.0, %v564_v8  ;;  %v502_v19 = vpack.c.bf16 %v181_v10, %v179_v15  ;;  %v504_v20 = vpack.c.bf16 %v180_v12, %v178_v16 }
  0x99   :  { %v578_v17 = vpop.permute.xlu1 %577  ;;  %v573_v18 = vpop.permute.xlu0 %572  ;;  %v294_v21 = vsel %vm64_vm4, %v564_v8, %v565_v7  ;;  %v311_v23 = vsel %vm89_vm3, %v569_v6, %v570_v5  ;;  %v298_v32 = vsel %vm700_vm2, %v297_v14, 0.0  ;;  %v315_v45 = vsel %vm714_vm6, %v314_v13, 0.0 }
  0x9a   :  { %v580_v24 = vunpack.i.h.bf16 %v578_v17  ;;  %v579_v25 = vunpack.i.l.bf16 %v578_v17  ;;  %v575_v26 = vunpack.i.h.bf16 %v573_v18  ;;  %v574_v27 = vunpack.i.l.bf16 %v573_v18  ;;  %503 = vmatprep.subr.bf16.mxu0 %v502_v19 }
  0x9b   :  { %v299_v29 = vsel %vm707_vm5, %v294_v21, 0.0  ;;  %v316_v30 = vsel %vm718_vm7, %v311_v23, 0.0  ;;  %505 = vmatpush1.bf16.msra.mxu0 %v504_v20  ;;  %v387_v59 = vsel %vm177_vm8, %v298_v32, %v365_v51  ;;  %v389_v60 = vsel %vm177_vm8, %v315_v45, %v736_v55 }
  0x9c   :  { %v331_v33 = vsel %vm117_vm9, %v580_v24, %v575_v26  ;;  %v334_v34 = vsel %vm117_vm9, %v575_v26, 0.0  ;;  %v118_v37 = vsel %vm117_vm9, %v579_v25, %v574_v27  ;;  %v121_v39 = vsel %vm117_vm9, %v574_v27, 0.0 }
  0x9d   :  { %v335_v40 = vsel %vm714_vm6, %v331_v33, 0.0  ;;  %v336_v41 = vsel %vm718_vm7, %v334_v34, 0.0  ;;  %v123_v42 = vsel %vm718_vm7, %v121_v39, 0.0  ;;  %v588_v43 = vpop.permute.xlu1 %587  ;;  %v583_v44 = vpop.permute.xlu0 %582  ;;  %v122_v48 = vsel %vm714_vm6, %v118_v37, 0.0 }
  0x9e   :  { %v378_v46 = vrot.slane %v335_v40, 4  ;;  %v379_v47 = vrot.slane %v336_v41, 4  ;;  %v169_v49 = vrot.slane %v123_v42, 4  ;;  %v590_v50 = vunpack.i.h.bf16 %v588_v43 }
  0x9f   :  { %v589_v52 = vunpack.i.l.bf16 %v588_v43  ;;  %v585_v53 = vunpack.i.h.bf16 %v583_v44  ;;  %v584_v56 = vunpack.i.l.bf16 %v583_v44  ;;  %v388_v57 = vsel %vm177_vm8, %v299_v29, %v366_v54 }
  0xa0   :  { %v390_v58 = vsel %vm177_vm8, %v316_v30, %v372_v31  ;;  %v168_v61 = vrot.slane %v122_v48, 4  ;;  %v344_v54 = vsel %vm128_vm10, %v590_v50, 0.0  ;;  %v512_v9 = vpack.c.bf16 %v389_v60, %v387_v59 }
  0xa1   :  { %v132_v62 = vsel %vm128_vm10, %v589_v52, 0.0  ;;  %v353_v63 = vsel %vm139_vm11, %v585_v53, 0.0  ;;  %v142_v4 = vsel %vm139_vm11, %v584_v56, 0.0  ;;  %v598_v5 = vpop.permute.xlu1 %597  ;;  %v593_v6 = vpop.permute.xlu0 %592  ;;  %v510_v51 = vpack.c.bf16 %v390_v58, %v388_v57 }
  0xa2   :  { %v134_v7 = vsel %vm707_vm5, %v132_v62, 0.0  ;;  %v384_v38 = vrot.slane %v353_v63, 4  ;;  %v174_v8 = vrot.slane %v142_v4, 4  ;;  %v600_v10 = vunpack.i.h.bf16 %v598_v5 }
  0xa3   :  { %v599_v55 = vunpack.i.l.bf16 %v598_v5  ;;  %v595_v11 = vunpack.i.h.bf16 %v593_v6  ;;  %v594_v12 = vunpack.i.l.bf16 %v593_v6  ;;  %v183_v13 = vsel %vm177_vm8, %v679_v2, %v169_v49  ;;  %511 = vmatprep.subr.bf16.mxu1 %v510_v51 }
  0xa4   :  { %v185_v14 = vsel %vm177_vm8, %v134_v7, %v174_v8  ;;  %v346_v15 = vsel %vm707_vm5, %v344_v54, 0.0  ;;  %v341_v17 = vsel %vm128_vm10, %v600_v10, %v590_v50  ;;  %513 = vmatpush1.bf16.msra.mxu1 %v512_v9  ;;  %v392_v24 = vsel %vm177_vm8, %v683_v3, %v379_v47 }
  0xa5   :  { %v129_v16 = vsel %vm128_vm10, %v599_v55, %v589_v52  ;;  %v357_v18 = vpop.permute.xlu1 %356  ;;  %v146_v19 = vpop.permute.xlu0 %145  ;;  %v506_v20 = vpack.c.bf16 %v185_v14, %v183_v13  ;;  %v140_v21 = vsel %vm139_vm11, %v594_v12, %v584_v56  ;;  %v351_v23 = vsel %vm139_vm11, %v595_v11, %v585_v53 }
  0xa6   :  { %v173_v25 = vrot.slane %v140_v21, 4  ;;  %v383_v26 = vrot.slane %v351_v23, 4  ;;  %v361_v28 = vsel %vm147_vm12, %v357_v18, 0.0  ;;  %v151_v27 = vsel %vm147_vm12, %v146_v19, 0.0 }
  0xa7   :  { %507 = vmatprep.subr.bf16.mxu0 %v506_v20  ;;  %v394_v29 = vsel %vm177_vm8, %v346_v15, %v384_v38  ;;  %v133_v30 = vsel %vm700_vm2, %v129_v16, 0.0  ;;  %v182_v31 = vsel %vm177_vm8, %v673_v0, %v168_v61  ;;  %v345_v32 = vsel %vm700_vm2, %v341_v17, 0.0 }
  0xa8   :  { %v514_v33 = vpack.c.bf16 %v394_v29, %v392_v24  ;;  %v184_v39 = vsel %vm177_vm8, %v133_v30, %v173_v25  ;;  %v391_v40 = vsel %vm177_vm8, %v675_v1, %v378_v46  ;;  %v393_v41 = vsel %vm177_vm8, %v345_v32, %v383_v26  ;;  %v28_v46 = vld [vmem:[%s867_s1] sm:$0xff] }
  0xa9   :  { %v355_v34 = vpop.permute.xlu1 %354  ;;  %v144_v37 = vpop.permute.xlu0 %143  ;;  %v363_v42 = vsel %vm718_vm7, %v361_v28, 0.0  ;;  %v153_v43 = vsel %vm718_vm7, %v151_v27, 0.0  ;;  %v508_v44 = vpack.c.bf16 %v184_v39, %v182_v31  ;;  %v516_v45 = vpack.c.bf16 %v393_v41, %v391_v40 }
  0xaa   :  { %515 = vmatprep.subr.bf16.mxu1 %v514_v33  ;;  %v358_v22 = vsel %vm147_vm12, %v355_v34, %v357_v18  ;;  %v148_v47 = vsel %vm147_vm12, %v144_v37, %v146_v19 }
  0xab   :  { %509 = vmatpush1.bf16.msra.mxu0 %v508_v44  ;;  %517 = vmatpush1.bf16.msra.mxu1 %v516_v45  ;;  %v362_v36 = vsel %vm714_vm6, %v358_v22, 0.0  ;;  %v152_v48 = vsel %vm714_vm6, %v148_v47, 0.0 }
  0xac   :  { %492 = vmatprep.subr.msk.mxu0 %vm177_vm8, %v153_v43  ;;  %495 = vmatprep.subr.msk.mxu1 %vm177_vm8, %v363_v42 }
  0xaf   :  { %493 = vmatpush1.msk.msra.mxu0 %vm177_vm8, %v152_v48  ;;  %496 = vmatpush1.msk.msra.mxu1 %vm177_vm8, %v362_v36 }
  0xb0   :  { %494 = vmatmul.mubr.msk.f32.vlgmr.msra.gmra.mrb[0].mxu0 %vm191_vm13, %v28_v46  ;;  %497 = vmatmul.mubr.msk.f32.vlgmr.msra.gmra.mrb[0].mxu1 %vm191_vm13, %v28_v46 }
  0xba   :  { %v189_v49 = vpop.permute.xlu0 %188 }
 0x183   :  { %v267_v50 = vpop.f32.mrb[0].mxu0  ;;  %v467_v52 = vpop.f32.mrb[0].mxu1 }
 0x184   :  { %v268_v53 = vadd.f32 %v267_v50, %v189_v49  ;;  %v468_v56 = vadd.f32 %v467_v52, %v189_v49  ;;  %v269_v57 = vpop.f32.mrb[1].mxu0  ;;  %v469_v58 = vpop.f32.mrb[1].mxu1 }
 0x185   :  { %v270_v59 = vadd.f32 %v269_v57, %v189_v49  ;;  %v470_v60 = vadd.f32 %v469_v58, %v189_v49 }
 0x186   :  { %v272_v61 = vmax.f32 %v268_v53, 0.0  ;;  %v472_v62 = vmax.f32 %v468_v56, 0.0 }
 0x187   :  { %v273_v63 = vmax.f32 %v270_v59, 0.0  ;;  %v473_v35 = vmax.f32 %v470_v60, 0.0 }
 0x188   :  { %v276_v4 = vrot.slane %v272_v61, 4  ;;  %v476_v5 = vrot.slane %v472_v62, 4 }
 0x189   :  { %v277_v6 = vrot.slane %v273_v63, 4  ;;  %v477_v54 = vrot.slane %v473_v35, 4 }
 0x18a   :  { %v280_v7 = vsel %vm177_vm8, %v673_v0, %v276_v4  ;;  %284 = vst [vmem:[%s869_s3 + $0x10] sm:$0xf] %v276_v4  ;;  %v480_v38 = vsel %vm177_vm8, %v675_v1, %v476_v5  ;;  %500 = vst [vmem:[%s869_s3 + $0x30] sm:$0xf] %v476_v5 }
 0x18b   :  { %282 = vst [vmem:[%s869_s3] sm:$0xff] %v280_v7  ;;  %498 = vst [vmem:[%s869_s3 + $0x20] sm:$0xff] %v480_v38  ;;  %v281_v0 = vsel %vm177_vm8, %v679_v2, %v277_v6  ;;  %v481_v1 = vsel %vm177_vm8, %v683_v3, %v477_v54 }
 0x18c   :  { %285 = vst [vmem:[%s869_s3 + $0x18] sm:$0xf] %v277_v6  ;;  %501 = vst [vmem:[%s869_s3 + $0x38] sm:$0xf] %v477_v54 }
 0x18d   :  { %283 = vst [vmem:[%s869_s3 + $0x8] sm:$0xff] %v281_v0  ;;  %499 = vst [vmem:[%s869_s3 + $0x28] sm:$0xff] %v481_v1 }
 0x18e   :  { %491 = vsyncpa [#allocation3], 1 }

</bundles_post_ra>
